<compile_context>
chip_gen: v5e
topology: v5e:2x2
jax: 0.10.0
libtpu: 0.0.40
codegen_flags: <defaults>
</compile_context>

<pallas_src>
import jax
import jax.numpy as jnp
from jax.experimental import pallas as pl
from jax.experimental.pallas import tpu as pltpu


def _patch_merging_kernel(x_ref, w_ref, g_ref, b_ref, o_ref):
    # x_ref: (TB, 2, W2, 2C)  row-pair strips; 2C channel dim = [even-col | odd-col]*C
    # w_ref: (2, 2C, 2C) bf16 permuted reduction weight; [0] = rows for (x0,x2), [1] = (x1,x3)
    # g_ref, b_ref: (2, 1, 2C) f32 permuted LayerNorm gamma / beta, same split
    # o_ref: (TB, W2, 2C)
    tb, _, w2, c2 = x_ref.shape
    c4 = 2 * c2
    rows = tb * w2

    x = x_ref[...]                                              # (TB, 2, W2, 2C)
    xe = x[:, 0, :, :].reshape(rows, c2).astype(jnp.float32)    # [x0 | x2]
    xo = x[:, 1, :, :].reshape(rows, c2).astype(jnp.float32)    # [x1 | x3]

    # Single-pass LayerNorm statistics over the full 4C feature.
    s1 = jnp.sum(xe, axis=-1, keepdims=True) + jnp.sum(xo, axis=-1, keepdims=True)
    s2 = (jnp.sum(xe * xe, axis=-1, keepdims=True)
          + jnp.sum(xo * xo, axis=-1, keepdims=True))
    mean = s1 * (1.0 / c4)
    var = jnp.maximum(s2 * (1.0 / c4) - mean * mean, 0.0)
    inv = jax.lax.rsqrt(var + 1e-5)                             # eps = nn.LayerNorm default

    g = g_ref[...]                                              # already f32 (host pre-cast)
    b = b_ref[...]
    ye = ((xe - mean) * inv * g[0] + b[0]).astype(jnp.bfloat16)
    yo = ((xo - mean) * inv * g[1] + b[1]).astype(jnp.bfloat16)

    w = w_ref[...]                                              # already bf16 (host pre-cast)
    out = (jnp.dot(ye, w[0], preferred_element_type=jnp.float32)
           + jnp.dot(yo, w[1], preferred_element_type=jnp.float32))
    o_ref[...] = out.reshape(tb, w2, c2).astype(o_ref.dtype)


def _pick_block_rows(bh2, w2, c2, in_bytes, out_bytes):
    # Aim for ~2K merged rows per grid step (per-step overhead ~0.35us), but
    # bound by a conservative VMEM budget (double-buffered in/out + f32/bf16
    # temps) so the kernel fits the default scoped VMEM even on v7x.
    # On v6e/v5e this budget (and vmem_limit_bytes) could be raised further.
    target = max(1, 2048 // max(w2, 1))
    bytes_per_tb = w2 * c2 * (4 * in_bytes + 2 * out_bytes + 16)
    cap = max(1, (24 * 1024 * 1024) // max(bytes_per_tb, 1))
    return int(max(1, min(bh2, target, cap)))


def patch_merging(x, w_t, gamma, beta):
    """x: (B, H, W, C); w_t: (4C, 2C) (transposed PyTorch Linear weight, no bias);
    gamma, beta: LayerNorm(4C) affine params.  Returns (B, H*W/4, 2C)."""
    B, H, W, C = x.shape
    H2, W2, C2, C4 = H // 2, W // 2, 2 * C, 4 * C

    # Pure row-major reshape (no strided gather in HBM):
    #   (B, H, W, C) -> (B*H/2, 2, W/2, 2C)
    # dim 1 = row parity; the 2C channel dim packs (col parity, C).
    xr = x.reshape(B * H2, 2, W2, C2)

    # Kernel channel order is [x0, x2, x1, x3]; permute params once on host.
    perm = jnp.arange(C4).reshape(4, C)[jnp.array([0, 2, 1, 3])].reshape(-1)
    w_p = jnp.take(w_t, perm, axis=0).astype(jnp.bfloat16).reshape(2, C2, C2)
    g_p = jnp.take(gamma.reshape(-1), perm).astype(jnp.float32).reshape(2, 1, C2)
    b_p = jnp.take(beta.reshape(-1), perm).astype(jnp.float32).reshape(2, 1, C2)

    bh2 = B * H2
    tb = _pick_block_rows(bh2, W2, C2, x.dtype.itemsize, x.dtype.itemsize)

    out = pl.pallas_call(
        _patch_merging_kernel,
        out_shape=jax.ShapeDtypeStruct((bh2, W2, C2), x.dtype),
        grid_spec=pltpu.PrefetchScalarGridSpec(
            num_scalar_prefetch=0,
            grid=(pl.cdiv(bh2, tb),),          # ragged last block is fine (no pad)
            in_specs=[
                pl.BlockSpec((tb, 2, W2, C2), lambda i: (i, 0, 0, 0)),
                pl.BlockSpec((2, C2, C2), lambda i: (0, 0, 0)),
                pl.BlockSpec((2, 1, C2), lambda i: (0, 0, 0)),
                pl.BlockSpec((2, 1, C2), lambda i: (0, 0, 0)),
            ],
            out_specs=pl.BlockSpec((tb, W2, C2), lambda i: (i, 0, 0)),
        ),
        compiler_params=pltpu.CompilerParams(
            dimension_semantics=("parallel",)),
    )(xr, w_p, g_p, b_p)

    return out.reshape(B, H2 * W2, C2)


def _reference(x, w_t, gamma, beta):
    B, H, W, C = x.shape
    x0 = x[:, 0::2, 0::2, :]
    x1 = x[:, 1::2, 0::2, :]
    x2 = x[:, 0::2, 1::2, :]
    x3 = x[:, 1::2, 1::2, :]
    xc = jnp.concatenate([x0, x1, x2, x3], axis=-1).reshape(B, -1, 4 * C)
    xc = xc.astype(jnp.float32)
    mean = jnp.mean(xc, axis=-1, keepdims=True)
    var = jnp.mean((xc - mean) ** 2, axis=-1, keepdims=True)
    xn = (xc - mean) * jax.lax.rsqrt(var + 1e-5)
    xn = xn * gamma.reshape(-1) + beta.reshape(-1)
    return jnp.dot(xn, w_t)


if __name__ == "__main__":
    # Module config: dim (= C) = 4 -> LayerNorm(4*dim=16), Linear 16 -> 8 (no bias).
    B, H, W, C = 2, 16, 16, 4

    key = jax.random.PRNGKey(0)
    kx, kw, kg, kb = jax.random.split(key, 4)

    x = jax.random.normal(kx, (B, H, W, C), dtype=jnp.float32)
    # PyTorch Linear weight is (out=2C, in=4C); kernel uses its transpose.
    w = jax.random.normal(kw, (2 * C, 4 * C), dtype=jnp.float32) * 0.05
    w_t = jnp.transpose(w)                                     # (4C, 2C)
    gamma = (1.0 + 0.1 * jax.random.normal(kg, (4 * C,))).astype(jnp.float32)
    beta = (0.1 * jax.random.normal(kb, (4 * C,))).astype(jnp.float32)

    fn = jax.jit(patch_merging)
    out = jax.block_until_ready(fn(x, w_t, gamma, beta))

    ref = _reference(x, w_t, gamma, beta)
    assert out.shape == (B, H * W // 4, 2 * C), out.shape
    # bf16 MXU inputs (f32 accumulation) -> slightly looser tolerance vs f32 ref.
    assert jnp.allclose(out, ref, atol=2e-2, rtol=2e-2), \
        float(jnp.max(jnp.abs(out - ref)))

    print("KERNEL_OK")
</pallas_src>

<mosaic_0001>
module attributes {stable_mosaic.version = 11 : i64} {
  func.func @_patch_merging_kernel(%arg0: i32, %arg1: memref<16x2x8x8xf32, #tpu.memory_space<vmem>>, %arg2: memref<2x8x8xbf16, #tpu.memory_space<vmem>>, %arg3: memref<2x1x8xf32, #tpu.memory_space<vmem>>, %arg4: memref<2x1x8xf32, #tpu.memory_space<vmem>>, %arg5: memref<16x8x8xf32, #tpu.memory_space<vmem>>) attributes {dimension_semantics = [#tpu.dimension_semantics<parallel>], iteration_bounds = array<i64: 1>, scalar_prefetch = 0 : i64, scratch_operands = 0 : i64, tpu.core_type = #tpu.core_type<tc>, window_params = [{transform_indices = @transform_0, window_bounds = array<i64: 16, 2, 8, 8>}, {pipeline_mode = #tpu.pipeline_mode<synchronous>, transform_indices = @transform_1, window_bounds = array<i64: 2, 8, 8>}, {pipeline_mode = #tpu.pipeline_mode<synchronous>, transform_indices = @transform_2, window_bounds = array<i64: 2, 1, 8>}, {pipeline_mode = #tpu.pipeline_mode<synchronous>, transform_indices = @transform_3, window_bounds = array<i64: 2, 1, 8>}, {transform_indices = @transform_4, window_bounds = array<i64: 16, 8, 8>}]} {
    %c0 = arith.constant 0 : index
    %c0_0 = arith.constant 0 : index
    %c0_1 = arith.constant 0 : index
    %c0_2 = arith.constant 0 : index
    %0 = vector.load %arg1[%c0, %c0_0, %c0_1, %c0_2] : memref<16x2x8x8xf32, #tpu.memory_space<vmem>>, vector<16x2x8x8xf32>
    %1 = vector.extract_strided_slice %0 {offsets = [0, 0, 0, 0], sizes = [16, 1, 8, 8], strides = [1, 1, 1, 1]} : vector<16x2x8x8xf32> to vector<16x1x8x8xf32>
    %2 = vector.shape_cast %1 : vector<16x1x8x8xf32> to vector<16x8x8xf32>
    %3 = vector.shape_cast %2 : vector<16x8x8xf32> to vector<128x8xf32>
    %4 = vector.extract_strided_slice %0 {offsets = [0, 1, 0, 0], sizes = [16, 1, 8, 8], strides = [1, 1, 1, 1]} : vector<16x2x8x8xf32> to vector<16x1x8x8xf32>
    %5 = vector.shape_cast %4 : vector<16x1x8x8xf32> to vector<16x8x8xf32>
    %6 = vector.shape_cast %5 : vector<16x8x8xf32> to vector<128x8xf32>
    %cst = arith.constant dense<0.000000e+00> : vector<128xf32>
    %7 = vector.multi_reduction <add>, %3, %cst [1] : vector<128x8xf32> to vector<128xf32>
    %8 = vector.shape_cast %7 : vector<128xf32> to vector<128x1xf32>
    %cst_3 = arith.constant dense<0.000000e+00> : vector<128xf32>
    %9 = vector.multi_reduction <add>, %6, %cst_3 [1] : vector<128x8xf32> to vector<128xf32>
    %10 = vector.shape_cast %9 : vector<128xf32> to vector<128x1xf32>
    %11 = arith.addf %8, %10 : vector<128x1xf32>
    %12 = arith.mulf %3, %3 : vector<128x8xf32>
    %cst_4 = arith.constant dense<0.000000e+00> : vector<128xf32>
    %13 = vector.multi_reduction <add>, %12, %cst_4 [1] : vector<128x8xf32> to vector<128xf32>
    %14 = vector.shape_cast %13 : vector<128xf32> to vector<128x1xf32>
    %15 = arith.mulf %6, %6 : vector<128x8xf32>
    %cst_5 = arith.constant dense<0.000000e+00> : vector<128xf32>
    %16 = vector.multi_reduction <add>, %15, %cst_5 [1] : vector<128x8xf32> to vector<128xf32>
    %17 = vector.shape_cast %16 : vector<128xf32> to vector<128x1xf32>
    %18 = arith.addf %14, %17 : vector<128x1xf32>
    %cst_6 = arith.constant 6.250000e-02 : f32
    %19 = vector.broadcast %cst_6 : f32 to vector<128x1xf32>
    %20 = arith.mulf %11, %19 : vector<128x1xf32>
    %cst_7 = arith.constant 6.250000e-02 : f32
    %21 = vector.broadcast %cst_7 : f32 to vector<128x1xf32>
    %22 = arith.mulf %18, %21 : vector<128x1xf32>
    %23 = arith.mulf %20, %20 : vector<128x1xf32>
    %24 = arith.subf %22, %23 : vector<128x1xf32>
    %cst_8 = arith.constant 0.000000e+00 : f32
    %25 = vector.broadcast %cst_8 : f32 to vector<128x1xf32>
    %26 = arith.maximumf %24, %25 : vector<128x1xf32>
    %cst_9 = arith.constant 9.99999974E-6 : f32
    %27 = vector.broadcast %cst_9 : f32 to vector<128x1xf32>
    %28 = arith.addf %26, %27 : vector<128x1xf32>
    %29 = math.rsqrt %28 : vector<128x1xf32>
    %c0_10 = arith.constant 0 : index
    %c0_11 = arith.constant 0 : index
    %c0_12 = arith.constant 0 : index
    %30 = vector.load %arg3[%c0_10, %c0_11, %c0_12] : memref<2x1x8xf32, #tpu.memory_space<vmem>>, vector<2x1x8xf32>
    %c0_13 = arith.constant 0 : index
    %c0_14 = arith.constant 0 : index
    %c0_15 = arith.constant 0 : index
    %31 = vector.load %arg4[%c0_13, %c0_14, %c0_15] : memref<2x1x8xf32, #tpu.memory_space<vmem>>, vector<2x1x8xf32>
    %32 = vector.broadcast %20 : vector<128x1xf32> to vector<128x8xf32>
    %33 = arith.subf %3, %32 : vector<128x8xf32>
    %34 = vector.broadcast %29 : vector<128x1xf32> to vector<128x8xf32>
    %35 = arith.mulf %33, %34 : vector<128x8xf32>
    %36 = vector.extract_strided_slice %30 {offsets = [0, 0, 0], sizes = [1, 1, 8], strides = [1, 1, 1]} : vector<2x1x8xf32> to vector<1x1x8xf32>
    %37 = vector.shape_cast %36 : vector<1x1x8xf32> to vector<1x8xf32>
    %38 = vector.broadcast %37 : vector<1x8xf32> to vector<128x8xf32>
    %39 = arith.mulf %35, %38 : vector<128x8xf32>
    %40 = vector.extract_strided_slice %31 {offsets = [0, 0, 0], sizes = [1, 1, 8], strides = [1, 1, 1]} : vector<2x1x8xf32> to vector<1x1x8xf32>
    %41 = vector.shape_cast %40 : vector<1x1x8xf32> to vector<1x8xf32>
    %42 = vector.broadcast %41 : vector<1x8xf32> to vector<128x8xf32>
    %43 = arith.addf %39, %42 : vector<128x8xf32>
    %44 = arith.truncf %43 : vector<128x8xf32> to vector<128x8xbf16>
    %45 = vector.broadcast %20 : vector<128x1xf32> to vector<128x8xf32>
    %46 = arith.subf %6, %45 : vector<128x8xf32>
    %47 = vector.broadcast %29 : vector<128x1xf32> to vector<128x8xf32>
    %48 = arith.mulf %46, %47 : vector<128x8xf32>
    %49 = vector.extract_strided_slice %30 {offsets = [1, 0, 0], sizes = [1, 1, 8], strides = [1, 1, 1]} : vector<2x1x8xf32> to vector<1x1x8xf32>
    %50 = vector.shape_cast %49 : vector<1x1x8xf32> to vector<1x8xf32>
    %51 = vector.broadcast %50 : vector<1x8xf32> to vector<128x8xf32>
    %52 = arith.mulf %48, %51 : vector<128x8xf32>
    %53 = vector.extract_strided_slice %31 {offsets = [1, 0, 0], sizes = [1, 1, 8], strides = [1, 1, 1]} : vector<2x1x8xf32> to vector<1x1x8xf32>
    %54 = vector.shape_cast %53 : vector<1x1x8xf32> to vector<1x8xf32>
    %55 = vector.broadcast %54 : vector<1x8xf32> to vector<128x8xf32>
    %56 = arith.addf %52, %55 : vector<128x8xf32>
    %57 = arith.truncf %56 : vector<128x8xf32> to vector<128x8xbf16>
    %c0_16 = arith.constant 0 : index
    %c0_17 = arith.constant 0 : index
    %c0_18 = arith.constant 0 : index
    %58 = vector.load %arg2[%c0_16, %c0_17, %c0_18] : memref<2x8x8xbf16, #tpu.memory_space<vmem>>, vector<2x8x8xbf16>
    %59 = vector.extract_strided_slice %58 {offsets = [0, 0, 0], sizes = [1, 8, 8], strides = [1, 1, 1]} : vector<2x8x8xbf16> to vector<1x8x8xbf16>
    %60 = vector.shape_cast %59 : vector<1x8x8xbf16> to vector<8x8xbf16>
    %cst_19 = arith.constant dense<0.000000e+00> : vector<128x8xf32>
    %61 = tpu.matmul %44, %60, %cst_19 {dimension_numbers = #tpu.dot_dimension_numbers<[1], [0], [0], [1], [0, 0, 1, 1], [], []>} : vector<128x8xbf16>, vector<8x8xbf16>, vector<128x8xf32> -> vector<128x8xf32>
    %62 = vector.extract_strided_slice %58 {offsets = [1, 0, 0], sizes = [1, 8, 8], strides = [1, 1, 1]} : vector<2x8x8xbf16> to vector<1x8x8xbf16>
    %63 = vector.shape_cast %62 : vector<1x8x8xbf16> to vector<8x8xbf16>
    %cst_20 = arith.constant dense<0.000000e+00> : vector<128x8xf32>
    %64 = tpu.matmul %57, %63, %cst_20 {dimension_numbers = #tpu.dot_dimension_numbers<[1], [0], [0], [1], [0, 0, 1, 1], [], []>} : vector<128x8xbf16>, vector<8x8xbf16>, vector<128x8xf32> -> vector<128x8xf32>
    %65 = arith.addf %61, %64 : vector<128x8xf32>
    %66 = vector.shape_cast %65 : vector<128x8xf32> to vector<16x8x8xf32>
    %c0_21 = arith.constant 0 : index
    %c0_22 = arith.constant 0 : index
    %c0_23 = arith.constant 0 : index
    %67 = vector.load %arg5[%c0_21, %c0_22, %c0_23] : memref<16x8x8xf32, #tpu.memory_space<vmem>>, vector<16x8x8xf32>
    tpu.vector_store %arg5[%c0_21, %c0_22, %c0_23], %66 {strides = array<i32>} : memref<16x8x8xf32, #tpu.memory_space<vmem>>, vector<16x8x8xf32>,
    return
  }
  func.func @transform_0(%arg0: i32) -> (i32, i32, i32, i32) {
    %c0_i32 = arith.constant 0 : i32
    %c0_i32_0 = arith.constant 0 : i32
    %c0_i32_1 = arith.constant 0 : i32
    %c0_i32_2 = arith.constant 0 : i32
    return %arg0, %c0_i32, %c0_i32_0, %c0_i32_1 : i32, i32, i32, i32
  }
  func.func @transform_1(%arg0: i32) -> (i32, i32, i32) {
    %c0_i32 = arith.constant 0 : i32
    %c0_i32_0 = arith.constant 0 : i32
    %c0_i32_1 = arith.constant 0 : i32
    %c0_i32_2 = arith.constant 0 : i32
    return %c0_i32, %c0_i32_0, %c0_i32_1 : i32, i32, i32
  }
  func.func @transform_2(%arg0: i32) -> (i32, i32, i32) {
    %c0_i32 = arith.constant 0 : i32
    %c0_i32_0 = arith.constant 0 : i32
    %c0_i32_1 = arith.constant 0 : i32
    %c0_i32_2 = arith.constant 0 : i32
    return %c0_i32, %c0_i32_0, %c0_i32_1 : i32, i32, i32
  }
  func.func @transform_3(%arg0: i32) -> (i32, i32, i32) {
    %c0_i32 = arith.constant 0 : i32
    %c0_i32_0 = arith.constant 0 : i32
    %c0_i32_1 = arith.constant 0 : i32
    %c0_i32_2 = arith.constant 0 : i32
    return %c0_i32, %c0_i32_0, %c0_i32_1 : i32, i32, i32
  }
  func.func @transform_4(%arg0: i32) -> (i32, i32, i32) {
    %c0_i32 = arith.constant 0 : i32
    %c0_i32_0 = arith.constant 0 : i32
    %c0_i32_1 = arith.constant 0 : i32
    return %arg0, %c0_i32, %c0_i32_0 : i32, i32, i32
  }
}

</mosaic_0001>

<bundles_post_ra>
// kernel: patch_merging.1
= control target key start
LH: loop header
LB: loop body
LE: loop exit
PB: predicated region body
PF: predicated region fallthrough
CT: control target
= control target key end

     0   :  { %vm50_vm0 = vcmask 64512   ;;  %vm749_vm1 = vcmask 1043456   ;;  %s1602_s0 = inlined_call_operand.vmem [shape: f32[16,2,8,8], index: 0, kind: input, shape index: {}]   ;;  %s1603_s2 = inlined_call_operand.vmem [shape: f32[2,1,8], index: 2, kind: input, shape index: {}]   ;;  %s1604_s3 = inlined_call_operand.vmem [shape: f32[2,1,8], index: 3, kind: input, shape index: {}]   ;;  %s1605_s1 = inlined_call_operand.vmem [shape: bf16[2,8,8], index: 1, kind: input, shape index: {}]   ;;  %s1606_s4 = inlined_call_operand.vmem [shape: f32[16,8,8], index: 4, kind: output, shape index: {}]  }
   0x1   :  { %v983_v0 = vld [vmem:[%s1602_s0 + $0x88] sm:$0xff]  ;;  %v988_v1 = vld [vmem:[%s1602_s0 + $0x80] sm:$0xff]  ;;  %v999_v5 = vld [vmem:[%s1602_s0 + $0x90] sm:$0xff] }
   0x2   :  { %v123_v2 = vsel %vm50_vm0, %v983_v0, 0.0  ;;  %v75_v3 = vsel %vm50_vm0, %v988_v1, 0.0  ;;  %v171_v4 = vmul.f32 %v988_v1, %v988_v1  ;;  %v1005_v7 = vld [vmem:[%s1602_s0 + $0x98] sm:$0xff]  ;;  %v172_v8 = vmul.f32 %v999_v5, %v999_v5  ;;  %v1021_v14 = vld [vmem:[%s1602_s0] sm:$0xff]  ;;  %v1030_v18 = vld [vmem:[%s1602_s0 + $0x10] sm:$0xff] }
   0x3   :  { %124 = vadd.xlane.f32.xlu1 %v123_v2  ;;  %76 = vadd.xlane.f32.xlu0 %v75_v3  ;;  %v126_v9 = vsel %vm50_vm0, %v1005_v7, 0.0  ;;  %v78_v10 = vsel %vm50_vm0, %v999_v5, 0.0  ;;  %v236_v12 = vmul.f32 %v1005_v7, %v1005_v7  ;;  %v235_v13 = vmul.f32 %v983_v0, %v983_v0  ;;  %v1035_v19 = vld [vmem:[%s1602_s0 + $0x8] sm:$0xff]  ;;  %v1040_v20 = vld [vmem:[%s1602_s0 + $0x18] sm:$0xff]  ;;  %v1062_v31 = vld [vmem:[%s1602_s0 + $0xa0] sm:$0xff] }
   0x4   :  { %v203_v6 = vsel %vm50_vm0, %v171_v4, 0.0  ;;  %v206_v11 = vsel %vm50_vm0, %v172_v8, 0.0  ;;  %v51_v17 = vsel %vm50_vm0, %v1021_v14, 0.0  ;;  %v54_v21 = vsel %vm50_vm0, %v1030_v18, 0.0  ;;  %v1067_v32 = vld [vmem:[%s1602_s0 + $0xb0] sm:$0xff]  ;;  %v1077_v36 = vld [vmem:[%s1602_s0 + $0xb8] sm:$0xff] }
   0x5   :  { %204 = vadd.xlane.f32.xlu2 %v203_v6  ;;  %v270_v15 = vsel %vm50_vm0, %v236_v12, 0.0  ;;  %v267_v16 = vsel %vm50_vm0, %v235_v13, 0.0  ;;  %v99_v22 = vsel %vm50_vm0, %v1035_v19, 0.0  ;;  %v102_v23 = vsel %vm50_vm0, %v1040_v20, 0.0  ;;  %v1082_v37 = vld [vmem:[%s1602_s0 + $0xa8] sm:$0xff]  ;;  %v1103_v48 = vld [vmem:[%s1602_s0 + $0x30] sm:$0xff] }
   0x6   :  { %v164_v24 = vmul.f32 %v1030_v18, %v1030_v18  ;;  %v163_v25 = vmul.f32 %v1021_v14, %v1021_v14  ;;  %v227_v26 = vmul.f32 %v1035_v19, %v1035_v19  ;;  %v228_v30 = vmul.f32 %v1040_v20, %v1040_v20  ;;  %v1108_v49 = vld [vmem:[%s1602_s0 + $0x20] sm:$0xff]  ;;  %v1113_v50 = vld [vmem:[%s1602_s0 + $0x28] sm:$0xff]  ;;  %v1126_v55 = vld [vmem:[%s1602_s0 + $0x38] sm:$0xff] }
   0x7   :  { %v81_v33 = vsel %vm50_vm0, %v1062_v31, 0.0  ;;  %v84_v35 = vsel %vm50_vm0, %v1067_v32, 0.0  ;;  %v173_v38 = vmul.f32 %v1062_v31, %v1062_v31  ;;  %v132_v39 = vsel %vm50_vm0, %v1077_v36, 0.0  ;;  %v1141_v62 = vld [vmem:[%s1602_s0 + $0xc0] sm:$0xff]  ;;  %v1150_v4 = vld [vmem:[%s1602_s0 + $0xc8] sm:$0xff]  ;;  %v1155_v6 = vld [vmem:[%s1602_s0 + $0xd0] sm:$0xff] }
   0x8   :  { %v182_v27 = vsel %vm50_vm0, %v164_v24, 0.0  ;;  %v179_v28 = vsel %vm50_vm0, %v163_v25, 0.0  ;;  %v243_v29 = vsel %vm50_vm0, %v227_v26, 0.0  ;;  %v246_v34 = vsel %vm50_vm0, %v228_v30, 0.0  ;;  %v1160_v8 = vld [vmem:[%s1602_s0 + $0xd8] sm:$0xff]  ;;  %v1187_v24 = vld [vmem:[%s1602_s0 + $0x50] sm:$0xff] }
   0x9   :  { %v129_v40 = vsel %vm50_vm0, %v1082_v37, 0.0  ;;  %v209_v41 = vsel %vm50_vm0, %v173_v38, 0.0  ;;  %v237_v42 = vmul.f32 %v1082_v37, %v1082_v37  ;;  %v174_v43 = vmul.f32 %v1067_v32, %v1067_v32 }
   0xa   :  { %v238_v44 = vmul.f32 %v1077_v36, %v1077_v36  ;;  %v60_v51 = vsel %vm50_vm0, %v1103_v48, 0.0  ;;  %v57_v52 = vsel %vm50_vm0, %v1108_v49, 0.0  ;;  %v105_v53 = vsel %vm50_vm0, %v1113_v50, 0.0 }
   0xb   :  { %127 = vadd.xlane.f32.xlu1 %v126_v9  ;;  %79 = vadd.xlane.f32.xlu0 %v78_v10  ;;  %v273_v45 = vsel %vm50_vm0, %v237_v42, 0.0  ;;  %v212_v46 = vsel %vm50_vm0, %v174_v43, 0.0  ;;  %v165_v54 = vmul.f32 %v1108_v49, %v1108_v49  ;;  %v166_v56 = vmul.f32 %v1103_v48, %v1103_v48 }
   0xc   :  { %v276_v47 = vsel %vm50_vm0, %v238_v44, 0.0  ;;  %v108_v58 = vsel %vm50_vm0, %v1126_v55, 0.0  ;;  %v230_v60 = vmul.f32 %v1126_v55, %v1126_v55  ;;  %v229_v61 = vmul.f32 %v1113_v50, %v1113_v50 }
   0xd   :  { %207 = vadd.xlane.f32.xlu2 %v206_v11  ;;  %v185_v57 = vsel %vm50_vm0, %v165_v54, 0.0  ;;  %v188_v59 = vsel %vm50_vm0, %v166_v56, 0.0  ;;  %v87_v3 = vsel %vm50_vm0, %v1141_v62, 0.0  ;;  %v135_v9 = vsel %vm50_vm0, %v1150_v4, 0.0  ;;  %v47_v54 = vld [vmem:[%s1602_s0 + $0xe8] sm:$0xff] }
   0xe   :  { %v252_v63 = vsel %vm50_vm0, %v230_v60, 0.0  ;;  %v249_v2 = vsel %vm50_vm0, %v229_v61, 0.0  ;;  %v90_v10 = vsel %vm50_vm0, %v1155_v6, 0.0  ;;  %v138_v11 = vsel %vm50_vm0, %v1160_v8, 0.0 }
   0xf   :  { %v176_v12 = vmul.f32 %v1155_v6, %v1155_v6  ;;  %v175_v13 = vmul.f32 %v1141_v62, %v1141_v62  ;;  %v141_v61 = vsel %vm50_vm0, %v47_v54, 0.0 }
  0x13   :  { %271 = vadd.xlane.f32.xlu1 %v270_v15  ;;  %268 = vadd.xlane.f32.xlu0 %v267_v16  ;;  %v239_v15 = vmul.f32 %v1150_v4, %v1150_v4  ;;  %v218_v16 = vsel %vm50_vm0, %v176_v12, 0.0 }
  0x15   :  { %52 = vadd.xlane.f32.xlu2 %v51_v17  ;;  %v215_v17 = vsel %vm50_vm0, %v175_v13, 0.0 }
  0x1b   :  { %55 = vadd.xlane.f32.xlu0 %v54_v21  ;;  %100 = vadd.xlane.f32.xlu1 %v99_v22  ;;  %v279_v21 = vsel %vm50_vm0, %v239_v15, 0.0  ;;  %v240_v22 = vmul.f32 %v1160_v8, %v1160_v8 }
  0x1d   :  { %103 = vadd.xlane.f32.xlu2 %v102_v23  ;;  %v1182_v23 = vld [vmem:[%s1602_s0 + $0x40] sm:$0xff]  ;;  %v282_v26 = vsel %vm50_vm0, %v240_v22, 0.0 }
  0x1e   :  { %v63_v25 = vsel %vm50_vm0, %v1182_v23, 0.0  ;;  %v167_v30 = vmul.f32 %v1182_v23, %v1182_v23 }
  0x23   :  { %183 = vadd.xlane.f32.xlu1 %v182_v27  ;;  %180 = vadd.xlane.f32.xlu0 %v179_v28  ;;  %v66_v27 = vsel %vm50_vm0, %v1187_v24, 0.0  ;;  %v1197_v28 = vld [vmem:[%s1602_s0 + $0x58] sm:$0xff] }
  0x24   :  { %v232_v42 = vmul.f32 %v1197_v28, %v1197_v28 }
  0x25   :  { %244 = vadd.xlane.f32.xlu2 %v243_v29  ;;  %v1202_v29 = vld [vmem:[%s1602_s0 + $0x48] sm:$0xff] }
  0x26   :  { %v231_v38 = vmul.f32 %v1202_v29, %v1202_v29 }
  0x28   :  { %v255_v44 = vsel %vm50_vm0, %v231_v38, 0.0 }
  0x2b   :  { %82 = vadd.xlane.f32.xlu1 %v81_v33  ;;  %247 = vadd.xlane.f32.xlu0 %v246_v34  ;;  %v114_v33 = vsel %vm50_vm0, %v1197_v28, 0.0  ;;  %v111_v34 = vsel %vm50_vm0, %v1202_v29, 0.0 }
  0x2d   :  { %85 = vadd.xlane.f32.xlu2 %v84_v35  ;;  %v191_v35 = vsel %vm50_vm0, %v167_v30, 0.0 }
  0x33   :  { %133 = vadd.xlane.f32.xlu1 %v132_v39  ;;  %130 = vadd.xlane.f32.xlu0 %v129_v40  ;;  %v168_v39 = vmul.f32 %v1187_v24, %v1187_v24 }
  0x35   :  { %210 = vadd.xlane.f32.xlu2 %v209_v41 }
  0x3b   :  { %274 = vadd.xlane.f32.xlu1 %v273_v45  ;;  %213 = vadd.xlane.f32.xlu0 %v212_v46  ;;  %v194_v45 = vsel %vm50_vm0, %v168_v39, 0.0  ;;  %v258_v46 = vsel %vm50_vm0, %v232_v42, 0.0  ;;  %v241_v42 = vmul.f32 %v47_v54, %v47_v54 }
  0x3d   :  { %277 = vadd.xlane.f32.xlu2 %v276_v47  ;;  %v48_v47 = vld [vmem:[%s1602_s0 + $0xf0] sm:$0xff] }
  0x3e   :  { %v178_v12 = vmul.f32 %v48_v47, %v48_v47 }
  0x40   :  { %v224_v38 = vsel %vm50_vm0, %v178_v12, 0.0 }
  0x43   :  { %61 = vadd.xlane.f32.xlu1 %v60_v51  ;;  %58 = vadd.xlane.f32.xlu0 %v57_v52  ;;  %v1226_v51 = vld [vmem:[%s1602_s0 + $0xe0] sm:$0xff] }
  0x45   :  { %106 = vadd.xlane.f32.xlu2 %v105_v53 }
  0x4b   :  { %186 = vadd.xlane.f32.xlu1 %v185_v57  ;;  %109 = vadd.xlane.f32.xlu0 %v108_v58  ;;  %v96_v57 = vsel %vm50_vm0, %v48_v47, 0.0  ;;  %v93_v58 = vsel %vm50_vm0, %v1226_v51, 0.0 }
  0x4d   :  { %189 = vadd.xlane.f32.xlu2 %v188_v59 }
  0x53   :  { %253 = vadd.xlane.f32.xlu1 %v252_v63  ;;  %250 = vadd.xlane.f32.xlu0 %v249_v2  ;;  %v177_v63 = vmul.f32 %v1226_v51, %v1226_v51 }
  0x55   :  { %88 = vadd.xlane.f32.xlu2 %v87_v3  ;;  %v221_v22 = vsel %vm50_vm0, %v177_v63, 0.0 }
  0x5b   :  { %136 = vadd.xlane.f32.xlu1 %v135_v9  ;;  %91 = vadd.xlane.f32.xlu0 %v90_v10  ;;  %v1244_v9 = vld [vmem:[%s1602_s0 + $0xf8] sm:$0xff] }
  0x5d   :  { %139 = vadd.xlane.f32.xlu2 %v138_v11 }
  0x63   :  { %219 = vadd.xlane.f32.xlu1 %v218_v16  ;;  %216 = vadd.xlane.f32.xlu0 %v215_v17  ;;  %v724_v16 = vld [vmem:[%s1605_s1 + $0x4] sm:$0xf]  ;;  %v723_v17 = vld [vmem:[%s1605_s1] sm:$0xf] }
  0x65   :  { %280 = vadd.xlane.f32.xlu2 %v279_v21 }
  0x6b   :  { %64 = vadd.xlane.f32.xlu1 %v63_v25  ;;  %283 = vadd.xlane.f32.xlu0 %v282_v26  ;;  %v144_v25 = vsel %vm50_vm0, %v1244_v9, 0.0  ;;  %v751_v26 = vsel %vm749_vm1, %v724_v16, 0 }
  0x6c   :  { %914 = vmatpush.bf16.msra.mxu2 %v751_v26  ;;  %760 = vmatpush.bf16.msra.mxu0 %v751_v26 }
  0x6d   :  { %67 = vadd.xlane.f32.xlu2 %v66_v27  ;;  %v827_v27 = vsel %vm749_vm1, %v723_v17, 0 }
  0x6e   :  { %915 = vmatpush.bf16.msra.mxu3 %v827_v27  ;;  %836 = vmatpush.bf16.msra.mxu1 %v827_v27 }
  0x73   :  { %115 = vadd.xlane.f32.xlu1 %v114_v33  ;;  %112 = vadd.xlane.f32.xlu0 %v111_v34 }
  0x75   :  { %192 = vadd.xlane.f32.xlu2 %v191_v35 }
  0x76   :  { %v125_v40 = vpop.xlane.xlu1 %124  ;;  %v77_v41 = vpop.xlane.xlu0 %76 }
  0x77   :  { %v155_v59 = vadd.f32 %v125_v40, %v77_v41  ;;  %v242_v41 = vmul.f32 %v1244_v9, %v1244_v9 }
  0x78   :  { %v205_v43 = vpop.xlane.xlu2 %204 }
  0x79   :  { %v1237_v2 = vmul.f32 0.0625, %v155_v59 }
  0x7b   :  { %256 = vadd.xlane.f32.xlu1 %v255_v44  ;;  %195 = vadd.xlane.f32.xlu0 %v194_v45  ;;  %v347_v34 = vmul.f32 %v1237_v2, %v1237_v2 }
  0x7d   :  { %259 = vadd.xlane.f32.xlu2 %v258_v46 }
  0x7e   :  { %v128_v52 = vpop.xlane.xlu1 %127  ;;  %v80_v53 = vpop.xlane.xlu0 %79 }
  0x7f   :  { %v156_v60 = vadd.f32 %v128_v52, %v80_v53  ;;  %v30_v53 = vld [vmem:[%s1602_s0 + $0x60] sm:$0xff] }
  0x80   :  { %v208_v56 = vpop.xlane.xlu2 %207  ;;  %v69_v54 = vsel %vm50_vm0, %v30_v53, 0.0 }
  0x81   :  { %v1239_v3 = vmul.f32 0.0625, %v156_v60  ;;  %v1274_v60 = vld [vmem:[%s1602_s0 + $0x68] sm:$0xff] }
  0x83   :  { %97 = vadd.xlane.f32.xlu1 %v96_v57  ;;  %94 = vadd.xlane.f32.xlu0 %v93_v58  ;;  %v348_v33 = vmul.f32 %v1239_v3, %v1239_v3  ;;  %v288_v57 = vsel %vm50_vm0, %v242_v41, 0.0  ;;  %v285_v58 = vsel %vm50_vm0, %v241_v42, 0.0 }
  0x85   :  { %142 = vadd.xlane.f32.xlu2 %v141_v61  ;;  %v1279_v61 = vld [vmem:[%s1602_s0 + $0x70] sm:$0xff] }
  0x86   :  { %v272_v10 = vpop.xlane.xlu1 %271  ;;  %v269_v11 = vpop.xlane.xlu0 %268  ;;  %v170_v42 = vmul.f32 %v1279_v61, %v1279_v61 }
  0x87   :  { %v300_v13 = vadd.f32 %v272_v10, %v208_v56  ;;  %v299_v15 = vadd.f32 %v269_v11, %v205_v43 }
  0x88   :  { %v53_v21 = vpop.xlane.xlu2 %52 }
  0x89   :  { %v332_v30 = vmul.f32 0.0625, %v300_v13  ;;  %v331_v35 = vmul.f32 0.0625, %v299_v15  ;;  %v1286_v13 = vld [vmem:[%s1602_s0 + $0x78] sm:$0xff] }
  0x8b   :  { %v364_v39 = vsub.f32 %v332_v30, %v348_v33  ;;  %v363_v40 = vsub.f32 %v331_v35, %v347_v34  ;;  %222 = vadd.xlane.f32.xlu1 %v221_v22  ;;  %145 = vadd.xlane.f32.xlu0 %v144_v25  ;;  %v72_v22 = vsel %vm50_vm0, %v1279_v61, 0.0  ;;  %v120_v33 = vsel %vm50_vm0, %v1286_v13, 0.0 }
  0x8c   :  { %v169_v34 = vmul.f32 %v30_v53, %v30_v53 }
  0x8d   :  { %v380_v43 = vmax.f32 %v364_v39, 0.0  ;;  %v379_v44 = vmax.f32 %v363_v40, 0.0  ;;  %225 = vadd.xlane.f32.xlu2 %v224_v38  ;;  %v575_v40 = vsub.f32 %v988_v1, %v1237_v2  ;;  %v233_v1 = vmul.f32 %v1274_v60, %v1274_v60 }
  0x8e   :  { %v56_v45 = vpop.xlane.xlu0 %55  ;;  %v101_v46 = vpop.xlane.xlu1 %100 }
  0x8f   :  { %v396_v47 = vadd.f32 1e-05, %v380_v43  ;;  %v1262_v52 = vadd.f32 1e-05, %v379_v44  ;;  %v147_v59 = vadd.f32 %v101_v46, %v53_v21  ;;  %v117_v21 = vsel %vm50_vm0, %v1274_v60, 0.0 }
  0x90   :  { %v104_v56 = vpop.xlane.xlu2 %103  ;;  %v653_v43 = vsub.f32 %v983_v0, %v1237_v2  ;;  %v200_v2 = vsel %vm50_vm0, %v170_v42, 0.0 }
  0x91   :  { %920 = vrsqrt.f32 %v396_v47  ;;  %v1281_v12 = vmul.f32 0.0625, %v147_v59  ;;  %v148_v26 = vadd.f32 %v104_v56, %v56_v45  ;;  %vm499_vm4 = vweird.f32 %v396_v47 }
  0x92   :  { %922 = vrsqrt.f32 %v1262_v52  ;;  %vm489_vm5 = vweird.f32 %v1262_v52 }
  0x93   :  { %289 = vadd.xlane.f32.xlu1 %v288_v57  ;;  %286 = vadd.xlane.f32.xlu0 %v285_v58  ;;  %v339_v38 = vmul.f32 %v1281_v12, %v1281_v12  ;;  %v1303_v45 = vmul.f32 0.0625, %v148_v26  ;;  %v197_v58 = vsel %vm50_vm0, %v169_v34, 0.0  ;;  %v576_v26 = vsub.f32 %v999_v5, %v1239_v3  ;;  %v1336_v34 = vld [vmem:[%s1604_s3 + $0x1] ss:$0 sm:$0xff] }
  0x95   :  { %70 = vadd.xlane.f32.xlu2 %v69_v54 }
  0x96   :  { %v184_v63 = vpop.xlane.xlu1 %183  ;;  %v181_v10 = vpop.xlane.xlu0 %180 }
  0x97   :  { %v921_v11 = vpop.eup %920 }
  0x98   :  { %v923_v15 = vpop.eup %922  ;;  %v494_v16 = vmul.f32 %v921_v11, %v396_v47  ;;  %v245_v17 = vpop.xlane.xlu2 %244  ;;  %vm500_vm2 = vweird.f32 %v921_v11  ;;  %v261_v47 = vsel %vm50_vm0, %v233_v1, 0.0 }
  0x99   :  { %v484_v25 = vmul.f32 %v923_v15, %v1262_v52  ;;  %v291_v27 = vadd.f32 %v245_v17, %v181_v10  ;;  %vm490_vm3 = vweird.f32 %v923_v15  ;;  %vm501_vm6 = vmor %vm499_vm4, %vm500_vm2 }
  0x9a   :  { %v495_v30 = vmul.f32 %v921_v11, %v494_v16  ;;  %vm491_vm7 = vmor %vm489_vm5, %vm490_vm3 }
  0x9b   :  { %v485_v35 = vmul.f32 %v923_v15, %v484_v25  ;;  %v323_v39 = vmul.f32 0.0625, %v291_v27  ;;  %118 = vadd.xlane.f32.xlu1 %v117_v21  ;;  %73 = vadd.xlane.f32.xlu0 %v72_v22  ;;  %v340_v25 = vmul.f32 %v1303_v45, %v1303_v45  ;;  %v1323_v27 = vld [vmem:[%s1603_s2 + $0x1] ss:$0 sm:$0xff] }
  0x9c   :  { %v496_v41 = vmul.f32 0.5, %v495_v30  ;;  %v1328_v30 = vld [vmem:[%s1603_s2] ss:$0 sm:$0xff] }
  0x9d   :  { %v486_v44 = vmul.f32 0.5, %v485_v35  ;;  %v355_v46 = vsub.f32 %v323_v39, %v339_v38  ;;  %121 = vadd.xlane.f32.xlu2 %v120_v33  ;;  %v1341_v39 = vld [vmem:[%s1604_s3] ss:$0 sm:$0xff] }
  0x9e   :  { %v497_v53 = vsub.f32 1.5, %v496_v41  ;;  %v83_v56 = vpop.xlane.xlu1 %82  ;;  %v248_v57 = vpop.xlane.xlu0 %247 }
  0x9f   :  { %v487_v54 = vsub.f32 1.5, %v486_v44  ;;  %v371_v59 = vmax.f32 %v355_v46, 0.0  ;;  %v292_v10 = vadd.f32 %v248_v57, %v184_v63  ;;  %v654_v63 = vsub.f32 %v1005_v7, %v1239_v3 }
  0xa0   :  { %v498_v16 = vmul.f32 %v921_v11, %v497_v53  ;;  %v86_v0 = vpop.xlane.xlu2 %85  ;;  %v234_v3 = vmul.f32 %v1286_v13, %v1286_v13 }
  0xa1   :  { %v488_v17 = vmul.f32 %v923_v15, %v487_v54  ;;  %v1310_v21 = vadd.f32 1e-05, %v371_v59  ;;  %v324_v22 = vmul.f32 0.0625, %v292_v10 }
  0xa2   :  { %v502_v52 = vsel %vm501_vm6, %v921_v11, %v498_v16 }
  0xa3   :  { %924 = vrsqrt.f32 %v1310_v21  ;;  %v356_v5 = vsub.f32 %v324_v22, %v340_v25  ;;  %198 = vadd.xlane.f32.xlu0 %v197_v58  ;;  %v492_v7 = vsel %vm491_vm7, %v923_v15, %v488_v17  ;;  %201 = vadd.xlane.f32.xlu1 %v200_v2  ;;  %v670_v33 = vmul.f32 %v654_v63, %v502_v52 }
  0xa4   :  { %v669_v11 = vmul.f32 %v653_v43, %v492_v7  ;;  %v591_v35 = vmul.f32 %v575_v40, %v492_v7  ;;  %v592_v38 = vmul.f32 %v576_v26, %v502_v52  ;;  %v264_v40 = vsel %vm50_vm0, %v234_v3, 0.0 }
  0xa5   :  { %v372_v41 = vmax.f32 %v356_v5, 0.0  ;;  %262 = vadd.xlane.f32.xlu2 %v261_v47  ;;  %v689_v43 = vmul.f32 %v1323_v27, %v670_v33  ;;  %vm409_vm9 = vweird.f32 %v1310_v21 }
  0xa6   :  { %v134_v15 = vpop.xlane.xlu1 %133  ;;  %v131_v42 = vpop.xlane.xlu0 %130  ;;  %v688_v44 = vmul.f32 %v1323_v27, %v669_v11  ;;  %v610_v46 = vmul.f32 %v1328_v30, %v591_v35  ;;  %v611_v53 = vmul.f32 %v1328_v30, %v592_v38 }
  0xa7   :  { %v388_v57 = vadd.f32 1e-05, %v372_v41  ;;  %v708_v54 = vadd.f32 %v1336_v34, %v689_v43  ;;  %v157_v2 = vadd.f32 %v131_v42, %v83_v56  ;;  %v158_v26 = vadd.f32 %v134_v15, %v86_v0 }
  0xa8   :  { %v211_v58 = vpop.xlane.xlu2 %210  ;;  %v707_v1 = vadd.f32 %v1336_v34, %v688_v44  ;;  %v629_v59 = vadd.f32 %v1341_v39, %v610_v46  ;;  %v630_v10 = vadd.f32 %v1341_v39, %v611_v53 }
  0xa9   :  { %v925_v16 = vpop.eup %924  ;;  %926 = vrsqrt.f32 %v388_v57  ;;  %v1355_v47 = vmul.f32 0.0625, %v157_v2  ;;  %v1357_v11 = vmul.f32 0.0625, %v158_v26  ;;  %vm419_vm12 = vweird.f32 %v388_v57 }
  0xaa   :  { %v404_v17 = vmul.f32 %v925_v16, %v1310_v21  ;;  %v719_v22 = vpack.c.bf16 %v708_v54, %v707_v1  ;;  %v641_v25 = vpack.c.bf16 %v630_v10, %v629_v59  ;;  %vm410_vm8 = vweird.f32 %v925_v16 }
  0xab   :  { %265 = vadd.xlane.f32.xlu0 %v264_v40  ;;  %v349_v41 = vmul.f32 %v1355_v47, %v1355_v47  ;;  %vm411_vm10 = vmor %vm409_vm9, %vm410_vm8  ;;  %v350_v46 = vmul.f32 %v1357_v11, %v1357_v11  ;;  %v645_v1 = vsub.f32 %v1035_v19, %v1281_v12  ;;  %v567_v10 = vsub.f32 %v1021_v14, %v1281_v12 }
  0xac   :  { %v405_v63 = vmul.f32 %v925_v16, %v404_v17  ;;  %902 = vmatmul.msk.bf16.vlgmr.msra.gmra.mxu2 %vm50_vm0, %v719_v22  ;;  %910 = vmatmul.msk.bf16.vlgmr.msra.gmra.mxu3 %vm50_vm0, %v641_v25  ;;  %v568_v14 = vsub.f32 %v1030_v18, %v1303_v45 }
  0xae   :  { %v406_v52 = vmul.f32 0.5, %v405_v63  ;;  %v275_v5 = vpop.xlane.xlu1 %274  ;;  %v214_v7 = vpop.xlane.xlu0 %213 }
  0xaf   :  { %v927_v3 = vpop.eup %926  ;;  %v301_v56 = vadd.f32 %v275_v5, %v211_v58 }
  0xb0   :  { %v407_v33 = vsub.f32 1.5, %v406_v52  ;;  %v414_v35 = vmul.f32 %v927_v3, %v388_v57  ;;  %v278_v38 = vpop.xlane.xlu2 %277  ;;  %vm420_vm11 = vweird.f32 %v927_v3 }
  0xb1   :  { %v333_v0 = vmul.f32 0.0625, %v301_v56  ;;  %v302_v15 = vadd.f32 %v278_v38, %v214_v7  ;;  %vm421_vm13 = vmor %vm419_vm12, %vm420_vm11 }
  0xb2   :  { %v408_v42 = vmul.f32 %v925_v16, %v407_v33  ;;  %v415_v44 = vmul.f32 %v927_v3, %v414_v35 }
  0xb3   :  { %v365_v43 = vsub.f32 %v333_v0, %v349_v41  ;;  %v334_v53 = vmul.f32 0.0625, %v302_v15 }
  0xb4   :  { %v416_v40 = vmul.f32 0.5, %v415_v44  ;;  %v412_v58 = vsel %vm411_vm10, %v925_v16, %v408_v42  ;;  %v646_v16 = vsub.f32 %v1040_v20, %v1303_v45 }
  0xb5   :  { %v381_v54 = vmax.f32 %v365_v43, 0.0  ;;  %v366_v59 = vsub.f32 %v334_v53, %v350_v46  ;;  %v661_v26 = vmul.f32 %v645_v1, %v412_v58  ;;  %v583_v5 = vmul.f32 %v567_v10, %v412_v58 }
  0xb6   :  { %v417_v2 = vsub.f32 1.5, %v416_v40  ;;  %v62_v21 = vpop.xlane.xlu1 %61  ;;  %v59_v17 = vpop.xlane.xlu0 %58 }
  0xb7   :  { %v397_v22 = vadd.f32 1e-05, %v381_v54  ;;  %v382_v25 = vmax.f32 %v366_v59, 0.0  ;;  %v680_v56 = vmul.f32 %v1323_v27, %v661_v26  ;;  %v602_v35 = vmul.f32 %v1328_v30, %v583_v5 }
  0xb8   :  { %v418_v63 = vmul.f32 %v927_v3, %v417_v2  ;;  %v107_v52 = vpop.xlane.xlu2 %106 }
  0xb9   :  { %928 = vrsqrt.f32 %v397_v22  ;;  %v398_v19 = vadd.f32 1e-05, %v382_v25  ;;  %v699_v15 = vadd.f32 %v1336_v34, %v680_v56  ;;  %v149_v46 = vadd.f32 %v107_v52, %v59_v17 }
  0xba   :  { %v422_v12 = vsel %vm421_vm13, %v927_v3, %v418_v63  ;;  %v621_v3 = vadd.f32 %v1341_v39, %v602_v35  ;;  %v655_v52 = vsub.f32 %v1082_v37, %v1355_v47  ;;  %vm509_vm15 = vweird.f32 %v397_v22 }
  0xbb   :  { %930 = vrsqrt.f32 %v398_v19  ;;  %v662_v7 = vmul.f32 %v646_v16, %v422_v12  ;;  %v584_v33 = vmul.f32 %v568_v14, %v422_v12  ;;  %v1382_v2 = vmul.f32 0.0625, %v149_v46 }
  0xbc   :  { %vm519_vm3 = vweird.f32 %v398_v19 }
  0xbd   :  { %v681_v57 = vmul.f32 %v1323_v27, %v662_v7  ;;  %v603_v20 = vmul.f32 %v1328_v30, %v584_v33 }
  0xbe   :  { %v187_v38 = vpop.xlane.xlu1 %186  ;;  %v110_v0 = vpop.xlane.xlu0 %109 }
  0xbf   :  { %v929_v41 = vpop.eup %928  ;;  %v700_v42 = vadd.f32 %v1336_v34, %v681_v57  ;;  %v622_v44 = vadd.f32 %v1341_v39, %v603_v20  ;;  %v150_v53 = vadd.f32 %v110_v0, %v62_v21  ;;  %v577_v21 = vsub.f32 %v1062_v31, %v1355_v47 }
  0xc0   :  { %v504_v18 = vmul.f32 %v929_v41, %v397_v22  ;;  %v190_v45 = vpop.xlane.xlu2 %189  ;;  %vm510_vm14 = vweird.f32 %v929_v41  ;;  %v341_v0 = vmul.f32 %v1382_v2, %v1382_v2  ;;  %v656_v31 = vsub.f32 %v1077_v36, %v1357_v11 }
  0xc1   :  { %v931_v43 = vpop.eup %930  ;;  %v715_v40 = vpack.c.bf16 %v700_v42, %v699_v15  ;;  %v637_v54 = vpack.c.bf16 %v622_v44, %v621_v3  ;;  %v1384_v25 = vmul.f32 0.0625, %v150_v53  ;;  %vm511_vm2 = vmor %vm509_vm15, %vm510_vm14  ;;  %v578_v42 = vsub.f32 %v1067_v32, %v1357_v11 }
  0xc2   :  { %v505_v58 = vmul.f32 %v929_v41, %v504_v18  ;;  %v514_v1 = vmul.f32 %v931_v43, %v398_v19  ;;  %vm520_vm1 = vweird.f32 %v931_v43 }
  0xc3   :  { %898 = vmatmul.msk.bf16.vlgmr.msra.gmra.mxu0 %vm50_vm0, %v715_v40  ;;  %906 = vmatmul.msk.bf16.vlgmr.msra.gmra.mxu1 %vm50_vm0, %v637_v54  ;;  %v342_v35 = vmul.f32 %v1384_v25, %v1384_v25  ;;  %vm521_vm4 = vmor %vm519_vm3, %vm520_vm1 }
  0xc4   :  { %v506_v59 = vmul.f32 0.5, %v505_v58  ;;  %v515_v10 = vmul.f32 %v931_v43, %v514_v1 }
  0xc6   :  { %v507_v26 = vsub.f32 1.5, %v506_v59  ;;  %v516_v63 = vmul.f32 0.5, %v515_v10  ;;  %v254_v5 = vpop.xlane.xlu1 %253  ;;  %v251_v17 = vpop.xlane.xlu0 %250 }
  0xc7   :  { %v294_v16 = vadd.f32 %v254_v5, %v190_v45  ;;  %v293_v14 = vadd.f32 %v251_v17, %v187_v38 }
  0xc8   :  { %v508_v12 = vmul.f32 %v929_v41, %v507_v26  ;;  %v517_v7 = vsub.f32 1.5, %v516_v63  ;;  %v89_v56 = vpop.xlane.xlu2 %88 }
  0xc9   :  { %v326_v33 = vmul.f32 0.0625, %v294_v16  ;;  %v325_v57 = vmul.f32 0.0625, %v293_v14 }
  0xca   :  { %v518_v37 = vmul.f32 %v931_v43, %v517_v7  ;;  %v512_v47 = vsel %vm511_vm2, %v929_v41, %v508_v12 }
  0xcb   :  { %v358_v22 = vsub.f32 %v326_v33, %v342_v35  ;;  %v357_v38 = vsub.f32 %v325_v57, %v341_v0  ;;  %v671_v20 = vmul.f32 %v655_v52, %v512_v47  ;;  %v593_v15 = vmul.f32 %v577_v21, %v512_v47 }
  0xcc   :  { %v522_v18 = vsel %vm521_vm4, %v931_v43, %v518_v37 }
  0xcd   :  { %v374_v45 = vmax.f32 %v358_v22, 0.0  ;;  %v373_v3 = vmax.f32 %v357_v38, 0.0  ;;  %v672_v44 = vmul.f32 %v656_v31, %v522_v18  ;;  %v690_v46 = vmul.f32 %v1323_v27, %v671_v20 }
  0xce   :  { %v137_v53 = vpop.xlane.xlu1 %136  ;;  %v92_v40 = vpop.xlane.xlu0 %91  ;;  %v594_v36 = vmul.f32 %v578_v42, %v522_v18  ;;  %v612_v19 = vmul.f32 %v1328_v30, %v593_v15 }
  0xcf   :  { %v390_v41 = vadd.f32 1e-05, %v374_v45  ;;  %v389_v58 = vadd.f32 1e-05, %v373_v3  ;;  %v691_v1 = vmul.f32 %v1323_v27, %v672_v44  ;;  %v709_v32 = vadd.f32 %v1336_v34, %v690_v46 }
  0xd0   :  { %v140_v54 = vpop.xlane.xlu2 %139  ;;  %v613_v59 = vmul.f32 %v1328_v30, %v594_v36  ;;  %v631_v43 = vadd.f32 %v1341_v39, %v612_v19  ;;  %v159_v26 = vadd.f32 %v137_v53, %v89_v56  ;;  %v569_v46 = vsub.f32 %v1108_v49, %v1382_v2 }
  0xd1   :  { %932 = vrsqrt.f32 %v390_v41  ;;  %v710_v11 = vadd.f32 %v1336_v34, %v691_v1  ;;  %v160_v35 = vadd.f32 %v140_v54, %v92_v40  ;;  %vm439_vm7 = vweird.f32 %v390_v41 }
  0xd2   :  { %934 = vrsqrt.f32 %v389_v58  ;;  %v632_v10 = vadd.f32 %v1341_v39, %v613_v59  ;;  %v1408_v16 = vmul.f32 0.0625, %v159_v26  ;;  %vm429_vm8 = vweird.f32 %v389_v58 }
  0xd3   :  { %v720_v63 = vpack.c.bf16 %v710_v11, %v709_v32  ;;  %v1412_v38 = vmul.f32 0.0625, %v160_v35  ;;  %v647_v59 = vsub.f32 %v1113_v50, %v1382_v2  ;;  %v570_v32 = vsub.f32 %v1103_v48, %v1384_v25 }
  0xd4   :  { %v642_v5 = vpack.c.bf16 %v632_v10, %v631_v43  ;;  %v351_v56 = vmul.f32 %v1408_v16, %v1408_v16  ;;  %v648_v49 = vsub.f32 %v1126_v55, %v1384_v25 }
  0xd5   :  { %903 = vmatmul.msk.bf16.gmra.mxu2 %vm50_vm0, %v720_v63  ;;  %v352_v54 = vmul.f32 %v1412_v38, %v1412_v38 }
  0xd6   :  { %911 = vmatmul.msk.bf16.gmra.mxu3 %vm50_vm0, %v642_v5  ;;  %v220_v17 = vpop.xlane.xlu1 %219  ;;  %v217_v21 = vpop.xlane.xlu0 %216 }
  0xd7   :  { %v933_v52 = vpop.eup %932 }
  0xd8   :  { %v935_v14 = vpop.eup %934  ;;  %v434_v12 = vmul.f32 %v933_v52, %v390_v41  ;;  %v281_v7 = vpop.xlane.xlu2 %280  ;;  %vm440_vm5 = vweird.f32 %v933_v52 }
  0xd9   :  { %v424_v33 = vmul.f32 %v935_v14, %v389_v58  ;;  %v303_v57 = vadd.f32 %v281_v7, %v217_v21  ;;  %vm430_vm6 = vweird.f32 %v935_v14  ;;  %vm441_vm9 = vmor %vm439_vm7, %vm440_vm5 }
  0xda   :  { %v435_v0 = vmul.f32 %v933_v52, %v434_v12  ;;  %vm431_vm10 = vmor %vm429_vm8, %vm430_vm6 }
  0xdb   :  { %v425_v31 = vmul.f32 %v935_v14, %v424_v33  ;;  %v335_v37 = vmul.f32 0.0625, %v303_v57 }
  0xdc   :  { %v436_v47 = vmul.f32 0.5, %v435_v0 }
  0xdd   :  { %v426_v22 = vmul.f32 0.5, %v425_v31  ;;  %v367_v20 = vsub.f32 %v335_v37, %v351_v56 }
  0xde   :  { %v437_v15 = vsub.f32 1.5, %v436_v47  ;;  %v65_v42 = vpop.xlane.xlu1 %64  ;;  %v284_v18 = vpop.xlane.xlu0 %283 }
  0xdf   :  { %v427_v45 = vsub.f32 1.5, %v426_v22  ;;  %v383_v3 = vmax.f32 %v367_v20, 0.0  ;;  %v304_v44 = vadd.f32 %v284_v18, %v220_v17 }
  0xe0   :  { %v438_v53 = vmul.f32 %v933_v52, %v437_v15  ;;  %v68_v40 = vpop.xlane.xlu2 %67 }
  0xe1   :  { %v428_v36 = vmul.f32 %v935_v14, %v427_v45  ;;  %v399_v19 = vadd.f32 1e-05, %v383_v3  ;;  %v336_v1 = vmul.f32 0.0625, %v304_v44 }
  0xe2   :  { %v442_v41 = vsel %vm441_vm9, %v933_v52, %v438_v53 }
  0xe3   :  { %936 = vrsqrt.f32 %v399_v19  ;;  %v368_v58 = vsub.f32 %v336_v1, %v352_v54  ;;  %v432_v11 = vsel %vm431_vm10, %v935_v14, %v428_v36  ;;  %v664_v10 = vmul.f32 %v648_v49, %v442_v41 }
  0xe4   :  { %v663_v43 = vmul.f32 %v647_v59, %v432_v11  ;;  %v585_v26 = vmul.f32 %v569_v46, %v432_v11  ;;  %v586_v63 = vmul.f32 %v570_v32, %v442_v41  ;;  %vm529_vm12 = vweird.f32 %v399_v19 }
  0xe5   :  { %v384_v5 = vmax.f32 %v368_v58, 0.0  ;;  %v683_v48 = vmul.f32 %v1323_v27, %v664_v10 }
  0xe6   :  { %v116_v17 = vpop.xlane.xlu1 %115  ;;  %v113_v21 = vpop.xlane.xlu0 %112  ;;  %v682_v50 = vmul.f32 %v1323_v27, %v663_v43  ;;  %v604_v2 = vmul.f32 %v1328_v30, %v585_v26  ;;  %v605_v55 = vmul.f32 %v1328_v30, %v586_v63  ;;  %v657_v43 = vsub.f32 %v1150_v4, %v1408_v16 }
  0xe7   :  { %v400_v25 = vadd.f32 1e-05, %v384_v5  ;;  %v702_v14 = vadd.f32 %v1336_v34, %v683_v48  ;;  %v151_v57 = vadd.f32 %v113_v21, %v65_v42  ;;  %v152_v37 = vadd.f32 %v116_v17, %v68_v40 }
  0xe8   :  { %v193_v52 = vpop.xlane.xlu2 %192  ;;  %v701_v12 = vadd.f32 %v1336_v34, %v682_v50  ;;  %v623_v7 = vadd.f32 %v1341_v39, %v604_v2  ;;  %v624_v33 = vadd.f32 %v1341_v39, %v605_v55  ;;  %v579_v63 = vsub.f32 %v1141_v62, %v1408_v16 }
  0xe9   :  { %v937_v35 = vpop.eup %936  ;;  %938 = vrsqrt.f32 %v400_v25  ;;  %v1435_v22 = vmul.f32 0.0625, %v151_v57  ;;  %v1437_v3 = vmul.f32 0.0625, %v152_v37  ;;  %vm539_vm15 = vweird.f32 %v400_v25 }
  0xea   :  { %v524_v0 = vmul.f32 %v937_v35, %v399_v19  ;;  %v716_v31 = vpack.c.bf16 %v702_v14, %v701_v12  ;;  %v638_v56 = vpack.c.bf16 %v624_v33, %v623_v7  ;;  %vm530_vm11 = vweird.f32 %v937_v35 }
  0xeb   :  { %v343_v40 = vmul.f32 %v1435_v22, %v1435_v22  ;;  %vm531_vm13 = vmor %vm529_vm12, %vm530_vm11  ;;  %v344_v49 = vmul.f32 %v1437_v3, %v1437_v3  ;;  %v658_v12 = vsub.f32 %v1160_v8, %v1412_v38  ;;  %v580_v62 = vsub.f32 %v1155_v6, %v1412_v38 }
  0xec   :  { %v525_v47 = vmul.f32 %v937_v35, %v524_v0  ;;  %899 = vmatmul.msk.bf16.gmra.mxu0 %vm50_vm0, %v716_v31  ;;  %907 = vmatmul.msk.bf16.gmra.mxu1 %vm50_vm0, %v638_v56 }
  0xee   :  { %v526_v20 = vmul.f32 0.5, %v525_v47  ;;  %v257_v15 = vpop.xlane.xlu1 %256  ;;  %v196_v18 = vpop.xlane.xlu0 %195 }
  0xef   :  { %v939_v45 = vpop.eup %938  ;;  %v295_v44 = vadd.f32 %v257_v15, %v193_v52 }
  0xf0   :  { %v527_v46 = vsub.f32 1.5, %v526_v20  ;;  %v534_v42 = vmul.f32 %v939_v45, %v400_v25  ;;  %v260_v53 = vpop.xlane.xlu2 %259  ;;  %vm540_vm14 = vweird.f32 %v939_v45 }
  0xf1   :  { %v327_v36 = vmul.f32 0.0625, %v295_v44  ;;  %v296_v1 = vadd.f32 %v260_v53, %v196_v18  ;;  %vm541_vm1 = vmor %vm539_vm15, %vm540_vm14 }
  0xf2   :  { %v528_v54 = vmul.f32 %v937_v35, %v527_v46  ;;  %v535_v59 = vmul.f32 %v939_v45, %v534_v42 }
  0xf3   :  { %v359_v32 = vsub.f32 %v327_v36, %v343_v40  ;;  %v328_v41 = vmul.f32 0.0625, %v296_v1 }
  0xf4   :  { %v536_v58 = vmul.f32 0.5, %v535_v59  ;;  %v532_v11 = vsel %vm531_vm13, %v937_v35, %v528_v54 }
  0xf5   :  { %v375_v10 = vmax.f32 %v359_v32, 0.0  ;;  %v360_v26 = vsub.f32 %v328_v41, %v344_v49  ;;  %v673_v48 = vmul.f32 %v657_v43, %v532_v11  ;;  %v595_v52 = vmul.f32 %v579_v63, %v532_v11 }
  0xf6   :  { %v537_v5 = vsub.f32 1.5, %v536_v58  ;;  %v98_v19 = vpop.xlane.xlu1 %97  ;;  %v95_v17 = vpop.xlane.xlu0 %94  ;;  %v571_v58 = vsub.f32 %v1182_v23, %v1435_v22  ;;  %v649_v11 = vsub.f32 %v1202_v29, %v1435_v22  ;;  %v650_v23 = vsub.f32 %v1197_v28, %v1437_v3 }
  0xf7   :  { %v391_v21 = vadd.f32 1e-05, %v375_v10  ;;  %v376_v50 = vmax.f32 %v360_v26, 0.0  ;;  %v692_v7 = vmul.f32 %v1323_v27, %v673_v48  ;;  %v614_v35 = vmul.f32 %v1328_v30, %v595_v52 }
  0xf8   :  { %v538_v2 = vmul.f32 %v939_v45, %v537_v5  ;;  %v143_v55 = vpop.xlane.xlu2 %142 }
  0xf9   :  { %940 = vrsqrt.f32 %v391_v21  ;;  %v392_v4 = vadd.f32 1e-05, %v376_v50  ;;  %v711_v56 = vadd.f32 %v1336_v34, %v692_v7  ;;  %v633_v47 = vadd.f32 %v1341_v39, %v614_v35 }
  0xfa   :  { %v542_v16 = vsel %vm541_vm1, %v939_v45, %v538_v2  ;;  %v161_v18 = vadd.f32 %v143_v55, %v95_v17  ;;  %vm449_vm3 = vweird.f32 %v391_v21 }
  0xfb   :  { %942 = vrsqrt.f32 %v392_v4  ;;  %v674_v14 = vmul.f32 %v658_v12, %v542_v16  ;;  %v596_v33 = vmul.f32 %v580_v62, %v542_v16  ;;  %vm459_vm6 = vweird.f32 %v392_v4 }
  0xfc   :  { %v1461_v1 = vmul.f32 0.0625, %v161_v18  ;;  %v572_v12 = vsub.f32 %v1187_v24, %v1437_v3 }
  0xfd   :  { %v693_v25 = vmul.f32 %v1323_v27, %v674_v14  ;;  %v615_v8 = vmul.f32 %v1328_v30, %v596_v33 }
  0xfe   :  { %v223_v57 = vpop.xlane.xlu1 %222  ;;  %v146_v0 = vpop.xlane.xlu0 %145  ;;  %v353_v48 = vmul.f32 %v1461_v1, %v1461_v1 }
  0xff   :  { %v941_v31 = vpop.eup %940  ;;  %v712_v37 = vadd.f32 %v1336_v34, %v693_v25  ;;  %v634_v20 = vadd.f32 %v1341_v39, %v615_v8  ;;  %v162_v45 = vadd.f32 %v146_v0, %v98_v19 }
 0x100   :  { %v444_v6 = vmul.f32 %v941_v31, %v391_v21  ;;  %v226_v38 = vpop.xlane.xlu2 %225  ;;  %vm450_vm2 = vweird.f32 %v941_v31 }
 0x101   :  { %v943_v15 = vpop.eup %942  ;;  %v721_v44 = vpack.c.bf16 %v712_v37, %v711_v56  ;;  %v643_v53 = vpack.c.bf16 %v634_v20, %v633_v47  ;;  %v1463_v54 = vmul.f32 0.0625, %v162_v45  ;;  %vm451_vm5 = vmor %vm449_vm3, %vm450_vm2 }
 0x102   :  { %v445_v46 = vmul.f32 %v941_v31, %v444_v6  ;;  %v454_v42 = vmul.f32 %v943_v15, %v392_v4  ;;  %vm460_vm4 = vweird.f32 %v943_v15 }
 0x103   :  { %904 = vmatmul.msk.bf16.gmra.mxu2 %vm50_vm0, %v721_v44  ;;  %912 = vmatmul.msk.bf16.gmra.mxu3 %vm50_vm0, %v643_v53  ;;  %v354_v17 = vmul.f32 %v1463_v54, %v1463_v54  ;;  %vm461_vm7 = vmor %vm459_vm6, %vm460_vm4 }
 0x104   :  { %v446_v36 = vmul.f32 0.5, %v445_v46  ;;  %v455_v40 = vmul.f32 %v943_v15, %v454_v42 }
 0x106   :  { %v447_v59 = vsub.f32 1.5, %v446_v36  ;;  %v456_v32 = vmul.f32 0.5, %v455_v40  ;;  %v290_v49 = vpop.xlane.xlu1 %289  ;;  %v287_v41 = vpop.xlane.xlu0 %286 }
 0x107   :  { %v306_v43 = vadd.f32 %v290_v49, %v226_v38  ;;  %v305_v10 = vadd.f32 %v287_v41, %v223_v57 }
 0x108   :  { %v448_v26 = vmul.f32 %v941_v31, %v447_v59  ;;  %v457_v63 = vsub.f32 1.5, %v456_v32  ;;  %v71_v5 = vpop.xlane.xlu2 %70 }
 0x109   :  { %v338_v19 = vmul.f32 0.0625, %v306_v43  ;;  %v337_v50 = vmul.f32 0.0625, %v305_v10 }
 0x10a   :  { %v458_v29 = vmul.f32 %v943_v15, %v457_v63  ;;  %v452_v22 = vsel %vm451_vm5, %v941_v31, %v448_v26 }
 0x10b   :  { %v370_v21 = vsub.f32 %v338_v19, %v354_v17  ;;  %v369_v2 = vsub.f32 %v337_v50, %v353_v48  ;;  %v665_v55 = vmul.f32 %v649_v11, %v452_v22  ;;  %v587_v52 = vmul.f32 %v571_v58, %v452_v22 }
 0x10c   :  { %v462_v62 = vsel %vm461_vm7, %v943_v15, %v458_v29  ;;  %v581_v48 = vsub.f32 %v1226_v51, %v1461_v1  ;;  %v953_v51 = vld [vmem:[%s1602_s0 + $0xf0] sm:$0xff] }
 0x10d   :  { %v386_v16 = vmax.f32 %v370_v21, 0.0  ;;  %v385_v14 = vmax.f32 %v369_v2, 0.0  ;;  %v666_v7 = vmul.f32 %v650_v23, %v462_v62  ;;  %v684_v33 = vmul.f32 %v1323_v27, %v665_v55  ;;  %v952_v55 = vld [vmem:[%s1602_s0 + $0xe8] sm:$0xff] }
 0x10e   :  { %v74_v35 = vpop.xlane.xlu0 %73  ;;  %v588_v25 = vmul.f32 %v572_v12, %v462_v62  ;;  %v606_v28 = vmul.f32 %v1328_v30, %v587_v52  ;;  %v119_v8 = vpop.xlane.xlu1 %118  ;;  %v659_v52 = vsub.f32 %v952_v55, %v1461_v1  ;;  %v582_v12 = vsub.f32 %v953_v51, %v1463_v54 }
 0x10f   :  { %v402_v4 = vadd.f32 1e-05, %v386_v16  ;;  %v401_v57 = vadd.f32 1e-05, %v385_v14  ;;  %v685_v0 = vmul.f32 %v1323_v27, %v666_v7  ;;  %v703_v24 = vadd.f32 %v1336_v34, %v684_v33 }
 0x110   :  { %v122_v31 = vpop.xlane.xlu2 %121  ;;  %v607_v56 = vmul.f32 %v1328_v30, %v588_v25  ;;  %v625_v37 = vadd.f32 %v1341_v39, %v606_v28  ;;  %v153_v38 = vadd.f32 %v119_v8, %v71_v5  ;;  %v660_v62 = vsub.f32 %v1244_v9, %v1463_v54 }
 0x111   :  { %944 = vrsqrt.f32 %v402_v4  ;;  %v704_v3 = vadd.f32 %v1336_v34, %v685_v0  ;;  %v154_v36 = vadd.f32 %v122_v31, %v74_v35  ;;  %vm559_vm10 = vweird.f32 %v402_v4 }
 0x112   :  { %946 = vrsqrt.f32 %v401_v57  ;;  %v626_v6 = vadd.f32 %v1341_v39, %v607_v56  ;;  %v1487_v45 = vmul.f32 0.0625, %v153_v38  ;;  %vm549_vm11 = vweird.f32 %v401_v57 }
 0x113   :  { %v717_v47 = vpack.c.bf16 %v704_v3, %v703_v24  ;;  %v1491_v10 = vmul.f32 0.0625, %v154_v36 }
 0x114   :  { %v639_v20 = vpack.c.bf16 %v626_v6, %v625_v37  ;;  %v345_v49 = vmul.f32 %v1487_v45, %v1487_v45 }
 0x115   :  { %900 = vmatmul.msk.bf16.gmra.mxu0 %vm50_vm0, %v717_v47  ;;  %v346_v2 = vmul.f32 %v1491_v10, %v1491_v10 }
 0x116   :  { %908 = vmatmul.msk.bf16.gmra.mxu1 %vm50_vm0, %v639_v20  ;;  %v199_v15 = vpop.xlane.xlu0 %198  ;;  %v202_v11 = vpop.xlane.xlu1 %201 }
 0x117   :  { %v945_v18 = vpop.eup %944 }
 0x118   :  { %v947_v44 = vpop.eup %946  ;;  %v554_v46 = vmul.f32 %v945_v18, %v402_v4  ;;  %v263_v42 = vpop.xlane.xlu2 %262  ;;  %vm560_vm8 = vweird.f32 %v945_v18 }
 0x119   :  { %v544_v53 = vmul.f32 %v947_v44, %v401_v57  ;;  %v297_v40 = vadd.f32 %v263_v42, %v199_v15  ;;  %vm550_vm9 = vweird.f32 %v947_v44  ;;  %vm561_vm12 = vmor %vm559_vm10, %vm560_vm8 }
 0x11a   :  { %v555_v59 = vmul.f32 %v945_v18, %v554_v46  ;;  %vm551_vm13 = vmor %vm549_vm11, %vm550_vm9 }
 0x11b   :  { %v545_v32 = vmul.f32 %v947_v44, %v544_v53  ;;  %v329_v41 = vmul.f32 0.0625, %v297_v40 }
 0x11c   :  { %v556_v58 = vmul.f32 0.5, %v555_v59 }
 0x11d   :  { %v546_v43 = vmul.f32 0.5, %v545_v32  ;;  %v361_v26 = vsub.f32 %v329_v41, %v345_v49  ;;  %v954_v49 = vld [vmem:[%s1602_s0 + $0x60] sm:$0xff] }
 0x11e   :  { %v557_v63 = vsub.f32 1.5, %v556_v58  ;;  %v266_v5 = vpop.xlane.xlu0 %265  ;;  %v573_v41 = vsub.f32 %v954_v49, %v1487_v45  ;;  %v651_v58 = vsub.f32 %v1274_v60, %v1487_v45 }
 0x11f   :  { %v547_v19 = vsub.f32 1.5, %v546_v43  ;;  %v377_v17 = vmax.f32 %v361_v26, 0.0  ;;  %v298_v50 = vadd.f32 %v266_v5, %v202_v11 }
 0x120   :  { %v558_v23 = vmul.f32 %v945_v18, %v557_v63 }
 0x121   :  { %v548_v29 = vmul.f32 %v947_v44, %v547_v19  ;;  %v393_v22 = vadd.f32 1e-05, %v377_v17  ;;  %v330_v21 = vmul.f32 0.0625, %v298_v50  ;;  %v574_v50 = vsub.f32 %v1279_v61, %v1491_v10 }
 0x122   :  { %v562_v16 = vsel %vm561_vm12, %v945_v18, %v558_v23 }
 0x123   :  { %948 = vrsqrt.f32 %v393_v22  ;;  %v362_v14 = vsub.f32 %v330_v21, %v346_v2  ;;  %v552_v7 = vsel %vm551_vm13, %v947_v44, %v548_v29  ;;  %v676_v35 = vmul.f32 %v660_v62, %v562_v16 }
 0x124   :  { %v675_v33 = vmul.f32 %v659_v52, %v552_v7  ;;  %v597_v25 = vmul.f32 %v581_v48, %v552_v7  ;;  %v598_v28 = vmul.f32 %v582_v12, %v562_v16  ;;  %vm469_vm15 = vweird.f32 %v393_v22 }
 0x125   :  { %v378_v1 = vmax.f32 %v362_v14, 0.0  ;;  %v695_v57 = vmul.f32 %v1323_v27, %v676_v35  ;;  %v652_v48 = vsub.f32 %v1286_v13, %v1491_v10 }
 0x126   :  { %v694_v4 = vmul.f32 %v1323_v27, %v675_v33  ;;  %v616_v0 = vmul.f32 %v1328_v30, %v597_v25  ;;  %v617_v8 = vmul.f32 %v1328_v30, %v598_v28 }
 0x127   :  { %v394_v9 = vadd.f32 1e-05, %v378_v1  ;;  %v714_v31 = vadd.f32 %v1336_v34, %v695_v57 }
 0x128   :  { %v713_v54 = vadd.f32 %v1336_v34, %v694_v4  ;;  %v635_v56 = vadd.f32 %v1341_v39, %v616_v0  ;;  %v636_v24 = vadd.f32 %v1341_v39, %v617_v8 }
 0x129   :  { %v949_v3 = vpop.eup %948  ;;  %950 = vrsqrt.f32 %v394_v9  ;;  %vm479_vm3 = vweird.f32 %v394_v9 }
 0x12a   :  { %v464_v37 = vmul.f32 %v949_v3, %v393_v22  ;;  %v722_v6 = vpack.c.bf16 %v714_v31, %v713_v54  ;;  %v644_v38 = vpack.c.bf16 %v636_v24, %v635_v56  ;;  %vm470_vm14 = vweird.f32 %v949_v3 }
 0x12b   :  { %vm471_vm1 = vmor %vm469_vm15, %vm470_vm14 }
 0x12c   :  { %v465_v47 = vmul.f32 %v949_v3, %v464_v37  ;;  %905 = vmatmul.msk.bf16.gmra.mxu2 %vm50_vm0, %v722_v6  ;;  %913 = vmatmul.msk.bf16.gmra.mxu3 %vm50_vm0, %v644_v38 }
 0x12e   :  { %v466_v20 = vmul.f32 0.5, %v465_v47 }
 0x12f   :  { %v951_v15 = vpop.eup %950  ;;  %v782_v18 = vpop.f32.mrf.mxu2 }
 0x130   :  { %v858_v44 = vpop.f32.mrf.mxu3  ;;  %v467_v46 = vsub.f32 1.5, %v466_v20  ;;  %v474_v42 = vmul.f32 %v951_v15, %v394_v9  ;;  %vm480_vm2 = vweird.f32 %v951_v15 }
 0x131   :  { %v859_v53 = vadd.f32 %v858_v44, %v782_v18  ;;  %vm481_vm4 = vmor %vm479_vm3, %vm480_vm2 }
 0x132   :  { %v468_v36 = vmul.f32 %v949_v3, %v467_v46  ;;  %v475_v40 = vmul.f32 %v951_v15, %v474_v42 }
 0x133   :  { %886 = vst.msk [vmem:[%s1606_s4 + $0x40] sm:$0xff] %vm50_vm0, %v859_v53 }
 0x134   :  { %v476_v59 = vmul.f32 0.5, %v475_v40  ;;  %v472_v32 = vsel %vm471_vm1, %v949_v3, %v468_v36 }
 0x135   :  { %v667_v63 = vmul.f32 %v651_v58, %v472_v32  ;;  %v589_v5 = vmul.f32 %v573_v41, %v472_v32 }
 0x136   :  { %v477_v11 = vsub.f32 1.5, %v476_v59 }
 0x137   :  { %v784_v43 = vpop.f32.mrf.mxu2  ;;  %v686_v23 = vmul.f32 %v1323_v27, %v667_v63  ;;  %v608_v22 = vmul.f32 %v1328_v30, %v589_v5 }
 0x138   :  { %v860_v26 = vpop.f32.mrf.mxu3  ;;  %v478_v19 = vmul.f32 %v951_v15, %v477_v11 }
 0x139   :  { %v861_v17 = vadd.f32 %v860_v26, %v784_v43  ;;  %v705_v2 = vadd.f32 %v1336_v34, %v686_v23  ;;  %v627_v10 = vadd.f32 %v1341_v39, %v608_v22 }
 0x13a   :  { %v482_v60 = vsel %vm481_vm4, %v951_v15, %v478_v19 }
 0x13b   :  { %887 = vst.msk [vmem:[%s1606_s4 + $0x48] sm:$0xff] %vm50_vm0, %v861_v17  ;;  %v668_v45 = vmul.f32 %v652_v48, %v482_v60  ;;  %v590_v29 = vmul.f32 %v574_v50, %v482_v60 }
 0x13d   :  { %v687_v21 = vmul.f32 %v1323_v27, %v668_v45  ;;  %v609_v61 = vmul.f32 %v1328_v30, %v590_v29 }
 0x13f   :  { %v706_v13 = vadd.f32 %v1336_v34, %v687_v21  ;;  %v628_v55 = vadd.f32 %v1341_v39, %v609_v61 }
 0x140   :  { %v762_v52 = vpop.f32.mrf.mxu0  ;;  %v838_v51 = vpop.f32.mrf.mxu1 }
 0x141   :  { %v718_v12 = vpack.c.bf16 %v706_v13, %v705_v2  ;;  %v640_v62 = vpack.c.bf16 %v628_v55, %v627_v10  ;;  %v839_v16 = vadd.f32 %v838_v51, %v762_v52 }
 0x143   :  { %901 = vmatmul.msk.bf16.gmra.mxu0 %vm50_vm0, %v718_v12  ;;  %909 = vmatmul.msk.bf16.gmra.mxu1 %vm50_vm0, %v640_v62  ;;  %878 = vst.msk [vmem:[%s1606_s4] sm:$0xff] %vm50_vm0, %v839_v16 }
 0x148   :  { %v764_v27 = vpop.f32.mrf.mxu0  ;;  %v840_v30 = vpop.f32.mrf.mxu1 }
 0x149   :  { %v841_v34 = vadd.f32 %v840_v30, %v764_v27 }
 0x14b   :  { %879 = vst.msk [vmem:[%s1606_s4 + $0x8] sm:$0xff] %vm50_vm0, %v841_v34 }
 0x158   :  { %v787_v39 = vpop.f32.mrf.mxu2 }
 0x159   :  { %v863_v14 = vpop.f32.mrf.mxu3 }
 0x15a   :  { %v864_v7 = vadd.f32 %v863_v14, %v787_v39 }
 0x15c   :  { %888 = vst.msk [vmem:[%s1606_s4 + $0x50] sm:$0xff] %vm50_vm0, %v864_v7 }
 0x160   :  { %v789_v33 = vpop.f32.mrf.mxu2 }
 0x161   :  { %v865_v35 = vpop.f32.mrf.mxu3 }
 0x162   :  { %v866_v25 = vadd.f32 %v865_v35, %v789_v33 }
 0x164   :  { %889 = vst.msk [vmem:[%s1606_s4 + $0x58] sm:$0xff] %vm50_vm0, %v866_v25 }
 0x169   :  { %v767_v28 = vpop.f32.mrf.mxu0  ;;  %v843_v1 = vpop.f32.mrf.mxu1 }
 0x16a   :  { %v844_v4 = vadd.f32 %v843_v1, %v767_v28 }
 0x16c   :  { %880 = vst.msk [vmem:[%s1606_s4 + $0x10] sm:$0xff] %vm50_vm0, %v844_v4 }
 0x171   :  { %v769_v57 = vpop.f32.mrf.mxu0  ;;  %v845_v0 = vpop.f32.mrf.mxu1 }
 0x172   :  { %v846_v8 = vadd.f32 %v845_v0, %v769_v57 }
 0x174   :  { %881 = vst.msk [vmem:[%s1606_s4 + $0x18] sm:$0xff] %vm50_vm0, %v846_v8 }
 0x186   :  { %v792_v9 = vpop.f32.mrf.mxu2  ;;  %v868_v54 = vpop.f32.mrf.mxu3 }
 0x187   :  { %v869_v31 = vadd.f32 %v868_v54, %v792_v9 }
 0x189   :  { %890 = vst.msk [vmem:[%s1606_s4 + $0x60] sm:$0xff] %vm50_vm0, %v869_v31 }
 0x18e   :  { %v794_v56 = vpop.f32.mrf.mxu2  ;;  %v870_v24 = vpop.f32.mrf.mxu3 }
 0x18f   :  { %v871_v3 = vadd.f32 %v870_v24, %v794_v56 }
 0x191   :  { %891 = vst.msk [vmem:[%s1606_s4 + $0x68] sm:$0xff] %vm50_vm0, %v871_v3 }
 0x192   :  { %v772_v37 = vpop.f32.mrf.mxu0 }
 0x193   :  { %v848_v6 = vpop.f32.mrf.mxu1 }
 0x194   :  { %v849_v38 = vadd.f32 %v848_v6, %v772_v37 }
 0x196   :  { %882 = vst.msk [vmem:[%s1606_s4 + $0x20] sm:$0xff] %vm50_vm0, %v849_v38 }
 0x19a   :  { %v774_v47 = vpop.f32.mrf.mxu0 }
 0x19b   :  { %v850_v20 = vpop.f32.mrf.mxu1 }
 0x19c   :  { %v851_v15 = vadd.f32 %v850_v20, %v774_v47 }
 0x19e   :  { %883 = vst.msk [vmem:[%s1606_s4 + $0x28] sm:$0xff] %vm50_vm0, %v851_v15 }
 0x1af   :  { %v797_v18 = vpop.f32.mrf.mxu2  ;;  %v873_v44 = vpop.f32.mrf.mxu3 }
 0x1b0   :  { %v874_v46 = vadd.f32 %v873_v44, %v797_v18 }
 0x1b2   :  { %892 = vst.msk [vmem:[%s1606_s4 + $0x70] sm:$0xff] %vm50_vm0, %v874_v46 }
 0x1b7   :  { %v799_v42 = vpop.f32.mrf.mxu2  ;;  %v875_v53 = vpop.f32.mrf.mxu3 }
 0x1b8   :  { %v876_v36 = vadd.f32 %v875_v53, %v799_v42 }
 0x1ba   :  { %893 = vst.msk [vmem:[%s1606_s4 + $0x78] sm:$0xff] %vm50_vm0, %v876_v36 }
 0x1c0   :  { %v777_v40 = vpop.f32.mrf.mxu0  ;;  %v853_v59 = vpop.f32.mrf.mxu1 }
 0x1c1   :  { %v854_v32 = vadd.f32 %v853_v59, %v777_v40 }
 0x1c3   :  { %884 = vst.msk [vmem:[%s1606_s4 + $0x30] sm:$0xff] %vm50_vm0, %v854_v32 }
 0x1c8   :  { %v779_v49 = vpop.f32.mrf.mxu0  ;;  %v855_v41 = vpop.f32.mrf.mxu1 }
 0x1c9   :  { %v856_v58 = vadd.f32 %v855_v41, %v779_v49 }
 0x1cb   :  { %885 = vst.msk [vmem:[%s1606_s4 + $0x38] sm:$0xff] %vm50_vm0, %v856_v58 }

</bundles_post_ra>
